<compile_context>
chip_gen: v7x
topology: tpu7x:2x2x1
jax: 0.10.0
libtpu: 0.0.40
codegen_flags: <defaults>
</compile_context>

<pallas_src>
import jax
import jax.numpy as jnp
from jax.experimental import pallas as pl
from jax.experimental.pallas import tpu as pltpu


def _mixpool_conv_kernel(alpha_ref, wt_ref, x_ref, o_ref):
    # alpha_ref: (1,) f32 in SMEM
    # wt_ref:    (C, Cout) conv weight, pre-transposed (constant across grid)
    # x_ref:     (2, 2, TR, C) -- four 2x2-window taps for TR pooled pixels
    # o_ref:     (TR, Cout)
    alpha = alpha_ref[0]
    x00 = x_ref[0, 0]
    x01 = x_ref[0, 1]
    x10 = x_ref[1, 0]
    x11 = x_ref[1, 1]
    mx = jnp.maximum(jnp.maximum(x00, x01), jnp.maximum(x10, x11))
    av = (x00 + x01 + x10 + x11) * 0.25
    pooled = alpha * mx + (1.0 - alpha) * av                 # (TR, C), f32 math on VPU
    out = jnp.dot(pooled.astype(wt_ref.dtype), wt_ref[...],
                  preferred_element_type=jnp.float32)        # 1x1 conv: one MXU matmul
    o_ref[...] = out.astype(o_ref.dtype)


def _pick_row_tile(total_rows: int, bytes_per_row: int,
                   target_bytes: int = 4 * 1024 * 1024) -> int:
    """Pick the pooled-pixel row tile (sublane extent of the blocks).

    Prefers the largest multiple-of-8 divisor of `total_rows` whose per-step
    block stays under ~target_bytes (multi-MiB -> near HBM roofline); falls
    back to the full extent, which is always a legal block size.
    """
    target = max(8, target_bytes // max(1, bytes_per_row))
    if total_rows <= target:
        return total_rows
    divs = set()
    i = 1
    while i * i <= total_rows:
        if total_rows % i == 0:
            divs.add(i)
            divs.add(total_rows // i)
        i += 1
    aligned = sorted(d for d in divs if d % 8 == 0)
    if not aligned:
        return total_rows
    under = [d for d in aligned if d <= target]
    return under[-1] if under else aligned[0]


@jax.jit
def mixpooling_alterchan(x, alpha, conv_weight):
    """Forward of MixPooling_AlterChan.

    x:           (N, C, H, W) float tensor (even H, W)
    alpha:       scalar / (1,) learned mixing parameter
    conv_weight: (Cout, C, 1, 1) or (Cout, C) 1x1 conv weight (no bias)
    returns:     (N, Cout, H//2, W//2)
    """
    n, c, h, w = x.shape
    assert h % 2 == 0 and w % 2 == 0, "2x2 pooling with stride 2 needs even H, W"
    assert jnp.issubdtype(x.dtype, jnp.floating), "float inputs only"
    oh, ow = h // 2, w // 2
    cout = conv_weight.shape[0]
    w2d = conv_weight.reshape(cout, c)

    # Layout plumbing (single XLA transpose): window taps -> leading axes,
    # channels -> lane axis.
    #   x_taps[hp, wp, (n*OH + i)*OW + j, c] = x[n, c, 2*i + hp, 2*j + wp]
    rows = n * oh * ow
    x_taps = jnp.transpose(x.reshape(n, c, oh, 2, ow, 2), (3, 5, 0, 2, 4, 1))
    x_taps = x_taps.reshape(2, 2, rows, c)

    wt = jnp.transpose(w2d)                                   # (C, Cout); no in-kernel .T
    alpha_arr = jnp.asarray(alpha, dtype=jnp.float32).reshape(1)

    itemsize = jnp.dtype(x.dtype).itemsize
    bytes_per_row = (4 * c + cout) * itemsize                 # taps in + conv out, per pixel
    tr = _pick_row_tile(rows, bytes_per_row)
    grid = (rows // tr,)

    flops = 2 * rows * c * cout + 8 * rows * c
    bytes_accessed = (x_taps.size + wt.size + rows * cout) * itemsize

    out_flat = pl.pallas_call(
        _mixpool_conv_kernel,
        out_shape=jax.ShapeDtypeStruct((rows, cout), x.dtype),
        grid_spec=pltpu.PrefetchScalarGridSpec(
            num_scalar_prefetch=0,
            grid=grid,
            in_specs=[
                pl.BlockSpec(memory_space=pltpu.MemorySpace.SMEM),    # alpha (scalar)
                pl.BlockSpec((c, cout), lambda i: (0, 0)),            # conv weight (tiny, const)
                pl.BlockSpec((2, 2, tr, c), lambda i: (0, 0, i, 0)),  # tap slab (multi-MiB)
            ],
            out_specs=pl.BlockSpec((tr, cout), lambda i: (i, 0)),
        ),
        compiler_params=pltpu.CompilerParams(
            dimension_semantics=("parallel",),
            vmem_limit_bytes=48 * 1024 * 1024,
        ),
        cost_estimate=pl.CostEstimate(
            flops=flops, transcendentals=0, bytes_accessed=bytes_accessed),
    )(alpha_arr, wt, x_taps)

    out = out_flat.reshape(n, oh, ow, cout)
    return jnp.transpose(out, (0, 3, 1, 2))


if __name__ == "__main__":
    key = jax.random.PRNGKey(0)
    kx, ka, kw = jax.random.split(key, 3)

    N, C, H, W, COUT = 2, 4, 16, 16, 8
    x = jax.random.normal(kx, (N, C, H, W), dtype=jnp.float32)
    alpha = jax.random.uniform(ka, (1,), dtype=jnp.float32)          # ~ torch.rand(1)
    conv_w = jax.random.normal(kw, (COUT, C, 1, 1), dtype=jnp.float32) * 0.1

    out = mixpooling_alterchan(x, alpha, conv_w)
    out = jax.block_until_ready(out)

    # Pure-JAX reference of the PyTorch forward.
    xr = x.reshape(N, C, H // 2, 2, W // 2, 2)
    mixed = alpha[0] * xr.max(axis=(3, 5)) + (1.0 - alpha[0]) * xr.mean(axis=(3, 5))
    ref = jnp.einsum("oc,nchw->nohw", conv_w.reshape(COUT, C), mixed)

    assert out.shape == (N, COUT, H // 2, W // 2), out.shape
    assert jnp.allclose(out, ref, atol=1e-4, rtol=1e-4), float(jnp.max(jnp.abs(out - ref)))

    print("KERNEL_OK")
</pallas_src>

<mosaic_0001>
module attributes {stable_mosaic.version = 11 : i64} {
  func.func @_mixpool_conv_kernel(%arg0: i32, %arg1: memref<1xf32, #tpu.memory_space<smem>>, %arg2: memref<4x8xf32, #tpu.memory_space<vmem>>, %arg3: memref<2x2x128x4xf32, #tpu.memory_space<vmem>>, %arg4: memref<128x8xf32, #tpu.memory_space<vmem>>) attributes {dimension_semantics = [#tpu.dimension_semantics<parallel>], iteration_bounds = array<i64: 1>, scalar_prefetch = 0 : i64, scratch_operands = 0 : i64, tpu.core_type = #tpu.core_type<tc>, window_params = [{transform_indices = @transform_0, window_bounds = array<i64: 1>}, {pipeline_mode = #tpu.pipeline_mode<synchronous>, transform_indices = @transform_1, window_bounds = array<i64: 4, 8>}, {transform_indices = @transform_2, window_bounds = array<i64: 2, 2, 128, 4>}, {transform_indices = @transform_3, window_bounds = array<i64: 128, 8>}]} {
    %c0 = arith.constant 0 : index
    %0 = memref.load %arg1[%c0] : memref<1xf32, #tpu.memory_space<smem>>
    %c0_0 = arith.constant 0 : index
    %c0_1 = arith.constant 0 : index
    %c0_2 = arith.constant 0 : index
    %c0_3 = arith.constant 0 : index
    %1 = vector.load %arg3[%c0_0, %c0_1, %c0_2, %c0_3] : memref<2x2x128x4xf32, #tpu.memory_space<vmem>>, vector<1x1x128x4xf32>
    %2 = vector.shape_cast %1 : vector<1x1x128x4xf32> to vector<128x4xf32>
    %c0_4 = arith.constant 0 : index
    %c1 = arith.constant 1 : index
    %c0_5 = arith.constant 0 : index
    %c0_6 = arith.constant 0 : index
    %3 = vector.load %arg3[%c0_4, %c1, %c0_5, %c0_6] : memref<2x2x128x4xf32, #tpu.memory_space<vmem>>, vector<1x1x128x4xf32>
    %4 = vector.shape_cast %3 : vector<1x1x128x4xf32> to vector<128x4xf32>
    %c1_7 = arith.constant 1 : index
    %c0_8 = arith.constant 0 : index
    %c0_9 = arith.constant 0 : index
    %c0_10 = arith.constant 0 : index
    %5 = vector.load %arg3[%c1_7, %c0_8, %c0_9, %c0_10] : memref<2x2x128x4xf32, #tpu.memory_space<vmem>>, vector<1x1x128x4xf32>
    %6 = vector.shape_cast %5 : vector<1x1x128x4xf32> to vector<128x4xf32>
    %c1_11 = arith.constant 1 : index
    %c1_12 = arith.constant 1 : index
    %c0_13 = arith.constant 0 : index
    %c0_14 = arith.constant 0 : index
    %7 = vector.load %arg3[%c1_11, %c1_12, %c0_13, %c0_14] : memref<2x2x128x4xf32, #tpu.memory_space<vmem>>, vector<1x1x128x4xf32>
    %8 = vector.shape_cast %7 : vector<1x1x128x4xf32> to vector<128x4xf32>
    %9 = arith.maximumf %2, %4 : vector<128x4xf32>
    %10 = arith.maximumf %6, %8 : vector<128x4xf32>
    %11 = arith.maximumf %9, %10 : vector<128x4xf32>
    %12 = arith.addf %2, %4 : vector<128x4xf32>
    %13 = arith.addf %12, %6 : vector<128x4xf32>
    %14 = arith.addf %13, %8 : vector<128x4xf32>
    %cst = arith.constant 2.500000e-01 : f32
    %15 = vector.broadcast %cst : f32 to vector<128x4xf32>
    %16 = arith.mulf %14, %15 : vector<128x4xf32>
    %17 = vector.broadcast %0 : f32 to vector<128x4xf32>
    %18 = arith.mulf %17, %11 : vector<128x4xf32>
    %cst_15 = arith.constant 1.000000e+00 : f32
    %19 = arith.subf %cst_15, %0 : f32
    %20 = vector.broadcast %19 : f32 to vector<128x4xf32>
    %21 = arith.mulf %20, %16 : vector<128x4xf32>
    %22 = arith.addf %18, %21 : vector<128x4xf32>
    %c0_16 = arith.constant 0 : index
    %c0_17 = arith.constant 0 : index
    %23 = vector.load %arg2[%c0_16, %c0_17] : memref<4x8xf32, #tpu.memory_space<vmem>>, vector<4x8xf32>
    %cst_18 = arith.constant dense<0.000000e+00> : vector<128x8xf32>
    %24 = tpu.matmul %22, %23, %cst_18 {dimension_numbers = #tpu.dot_dimension_numbers<[1], [0], [0], [1], [0, 0, 1, 1], [], []>} : vector<128x4xf32>, vector<4x8xf32>, vector<128x8xf32> -> vector<128x8xf32>
    %c0_19 = arith.constant 0 : index
    %c0_20 = arith.constant 0 : index
    %25 = vector.load %arg4[%c0_19, %c0_20] : memref<128x8xf32, #tpu.memory_space<vmem>>, vector<128x8xf32>
    tpu.vector_store %arg4[%c0_19, %c0_20], %24 {strides = array<i32>} : memref<128x8xf32, #tpu.memory_space<vmem>>, vector<128x8xf32>,
    return
  }
  func.func @transform_0(%arg0: i32) -> i32 {
    %c0_i32 = arith.constant 0 : i32
    %c0_i32_0 = arith.constant 0 : i32
    return %c0_i32 : i32
  }
  func.func @transform_1(%arg0: i32) -> (i32, i32) {
    %c0_i32 = arith.constant 0 : i32
    %c0_i32_0 = arith.constant 0 : i32
    %c0_i32_1 = arith.constant 0 : i32
    return %c0_i32, %c0_i32_0 : i32, i32
  }
  func.func @transform_2(%arg0: i32) -> (i32, i32, i32, i32) {
    %c0_i32 = arith.constant 0 : i32
    %c0_i32_0 = arith.constant 0 : i32
    %c0_i32_1 = arith.constant 0 : i32
    %c0_i32_2 = arith.constant 0 : i32
    return %c0_i32, %c0_i32_0, %arg0, %c0_i32_1 : i32, i32, i32, i32
  }
  func.func @transform_3(%arg0: i32) -> (i32, i32) {
    %c0_i32 = arith.constant 0 : i32
    %c0_i32_0 = arith.constant 0 : i32
    return %arg0, %c0_i32 : i32, i32
  }
}

</mosaic_0001>

<bundles_post_ra>
// kernel: mixpooling_alterchan.1
= control target key start
LH: loop header
LB: loop body
LE: loop exit
PB: predicated region body
PF: predicated region fallthrough
CT: control target
= control target key end

     0   :  { %vm296_vm0 = vcmask 1043456   ;;  %vm247_vm1 = vcmask 31744   ;;  %vm445_vm2 = vcmask 64512   ;;  %s913_s1 = inlined_call_operand.vmem [shape: f32[4,8], index: 1, kind: input, shape index: {}]   ;;  %s914_s0 = inlined_call_operand.<no memory space> [shape: f32[1], index: 0, kind: input, shape index: {}]   ;;  %s915_s2 = inlined_call_operand.vmem [shape: f32[2,2,128,4], index: 2, kind: input, shape index: {}]   ;;  %s916_s3 = inlined_call_operand.vmem [shape: f32[128,8], index: 3, kind: output, shape index: {}]  }
   0x1   :  { %v246_v0 = vld [vmem:[%s913_s1] sm:$0xf]  ;;  %s212_s20 = ssub.f32 1.0, %s914_s0  ;;  %v620_v9 = vstv %s914_s0  ;;  %v17_v17 = vld [vmem:[%s915_s2 + $0x8] sm:$0xff]  ;;  %v500_v37 = vld [vmem:[%s915_s2 + $0x190] sm:$0xff] }
   0x2   :  { %v16_v1 = vld [vmem:[%s915_s2] sm:$0xff]  ;;  %548 = vmatprep.subr.msk.mxu0 %vm296_vm0, %v246_v0  ;;  %574 = vmatprep.subr.msk.mxu1 %vm296_vm0, %v246_v0  ;;  %v467_v18 = vld [vmem:[%s915_s2 + $0x88] sm:$0xff]  ;;  %v18_v42 = vld [vmem:[%s915_s2 + $0x10] sm:$0xff] }
   0x3   :  { %v466_v2 = vld [vmem:[%s915_s2 + $0x80] sm:$0xff]  ;;  %549 = vmatpush3.msk.msra.mxu0 %vm296_vm0, %v246_v0  ;;  %575 = vmatpush3.msk.msra.mxu1 %vm296_vm0, %v246_v0  ;;  %v483_v19 = vld [vmem:[%s915_s2 + $0x108] sm:$0xff]  ;;  %v640_v21 = vstv %s212_s20  ;;  %v84_v23 = vmax.f32 %v17_v17, %v467_v18  ;;  %v132_v24 = vadd.f32 %v467_v18, %v17_v17  ;;  %v468_v43 = vld [vmem:[%s915_s2 + $0x90] sm:$0xff] }
   0x4   :  { %v482_v3 = vld [vmem:[%s915_s2 + $0x100] sm:$0xff]  ;;  %v83_v5 = vmax.f32 %v16_v1, %v466_v2  ;;  %v131_v6 = vadd.f32 %v466_v2, %v16_v1  ;;  %v499_v22 = vld [vmem:[%s915_s2 + $0x188] sm:$0xff]  ;;  %v484_v47 = vld [vmem:[%s915_s2 + $0x110] sm:$0xff]  ;;  %v85_v48 = vmax.f32 %v18_v42, %v468_v43  ;;  %v133_v57 = vadd.f32 %v468_v43, %v18_v42 }
   0x5   :  { %v498_v4 = vld [vmem:[%s915_s2 + $0x180] sm:$0xff]  ;;  %v25_v25 = vld [vmem:[%s915_s2 + $0x48] sm:$0xff]  ;;  %v100_v29 = vmax.f32 %v483_v19, %v499_v22  ;;  %v148_v34 = vadd.f32 %v483_v19, %v132_v24  ;;  %v101_v52 = vmax.f32 %v484_v47, %v500_v37  ;;  %v508_v53 = vld [vmem:[%s915_s2 + $0x1d0] sm:$0xff] }
   0x6   :  { %v24_v7 = vld [vmem:[%s915_s2 + $0x40] sm:$0xff]  ;;  %v99_v8 = vmax.f32 %v482_v3, %v498_v4  ;;  %v147_v13 = vadd.f32 %v482_v3, %v131_v6  ;;  %v475_v30 = vld [vmem:[%s915_s2 + $0xc8] sm:$0xff]  ;;  %v26_v58 = vld [vmem:[%s915_s2 + $0x50] sm:$0xff]  ;;  %v149_v3 = vadd.f32 %v484_v47, %v133_v57 }
   0x7   :  { %v474_v10 = vld [vmem:[%s915_s2 + $0xc0] sm:$0xff]  ;;  %v491_v31 = vld [vmem:[%s915_s2 + $0x148] sm:$0xff]  ;;  %v92_v35 = vmax.f32 %v25_v25, %v475_v30  ;;  %v116_v41 = vmax.f32 %v84_v23, %v100_v29  ;;  %v164_v44 = vadd.f32 %v499_v22, %v148_v34  ;;  %v140_v46 = vadd.f32 %v475_v30, %v25_v25  ;;  %v476_v59 = vld [vmem:[%s915_s2 + $0xd0] sm:$0xff] }
   0x8   :  { %v490_v11 = vld [vmem:[%s915_s2 + $0x140] sm:$0xff]  ;;  %v91_v14 = vmax.f32 %v24_v7, %v474_v10  ;;  %v139_v16 = vadd.f32 %v474_v10, %v24_v7  ;;  %v115_v20 = vmax.f32 %v83_v5, %v99_v8  ;;  %v163_v26 = vadd.f32 %v498_v4, %v147_v13  ;;  %v507_v32 = vld [vmem:[%s915_s2 + $0x1c8] sm:$0xff]  ;;  %v492_v63 = vld [vmem:[%s915_s2 + $0x150] sm:$0xff] }
   0x9   :  { %v506_v12 = vld [vmem:[%s915_s2 + $0x1c0] sm:$0xff]  ;;  %v108_v36 = vmax.f32 %v491_v31, %v507_v32  ;;  %v197_v51 = vmul.f32 %v620_v9, %v116_v41  ;;  %v180_v54 = vmul.f32 0.25, %v164_v44  ;;  %v156_v55 = vadd.f32 %v491_v31, %v140_v46  ;;  %v19_v5 = vld [vmem:[%s915_s2 + $0x18] sm:$0xff] }
   0xa   :  { %v107_v15 = vmax.f32 %v490_v11, %v506_v12  ;;  %v155_v28 = vadd.f32 %v490_v11, %v139_v16  ;;  %v196_v33 = vmul.f32 %v620_v9, %v115_v20  ;;  %v179_v38 = vmul.f32 0.25, %v163_v26  ;;  %v469_v6 = vld [vmem:[%s915_s2 + $0x98] sm:$0xff]  ;;  %v486_v41 = vld [vmem:[%s915_s2 + $0x120] sm:$0xff] }
   0xb   :  { %v124_v45 = vmax.f32 %v92_v35, %v108_v36  ;;  %v117_v62 = vmax.f32 %v85_v48, %v101_v52  ;;  %v93_v0 = vmax.f32 %v26_v58, %v476_v59  ;;  %v215_v1 = vmul.f32 %v640_v21, %v180_v54  ;;  %v501_v7 = vld [vmem:[%s915_s2 + $0x198] sm:$0xff]  ;;  %v20_v35 = vld [vmem:[%s915_s2 + $0x20] sm:$0xff] }
   0xc   :  { %v123_v27 = vmax.f32 %v91_v14, %v107_v15  ;;  %v171_v39 = vadd.f32 %v506_v12, %v155_v28  ;;  %v214_v49 = vmul.f32 %v640_v21, %v179_v38  ;;  %v172_v2 = vadd.f32 %v507_v32, %v156_v55  ;;  %v509_v13 = vld [vmem:[%s915_s2 + $0x1d8] sm:$0xff]  ;;  %v470_v36 = vld [vmem:[%s915_s2 + $0xa0] sm:$0xff] }
   0xd   :  { %v205_v56 = vmul.f32 %v620_v9, %v124_v45  ;;  %v109_v4 = vmax.f32 %v492_v63, %v508_v53  ;;  %v198_v10 = vmul.f32 %v620_v9, %v117_v62  ;;  %v141_v11 = vadd.f32 %v476_v59, %v26_v58  ;;  %v485_v18 = vld [vmem:[%s915_s2 + $0x118] sm:$0xff]  ;;  %v28_v47 = vld [vmem:[%s915_s2 + $0x60] sm:$0xff] }
   0xe   :  { %v204_v40 = vmul.f32 %v620_v9, %v123_v27  ;;  %v187_v50 = vmul.f32 0.25, %v171_v39  ;;  %v230_v60 = vadd.f32 %v214_v49, %v196_v33  ;;  %v86_v12 = vmax.f32 %v19_v5, %v469_v6  ;;  %v27_v19 = vld [vmem:[%s915_s2 + $0x58] sm:$0xff]  ;;  %v478_v48 = vld [vmem:[%s915_s2 + $0xe0] sm:$0xff] }
   0xf   :  { %v231_v14 = vadd.f32 %v215_v1, %v197_v51  ;;  %v188_v15 = vmul.f32 0.25, %v172_v2  ;;  %v165_v16 = vadd.f32 %v500_v37, %v149_v3  ;;  %v125_v17 = vmax.f32 %v93_v0, %v109_v4  ;;  %v477_v20 = vld [vmem:[%s915_s2 + $0xd8] sm:$0xff]  ;;  %v502_v37 = vld [vmem:[%s915_s2 + $0x1a0] sm:$0xff]  ;;  %v471_v0 = vld [vmem:[%s915_s2 + $0xa8] sm:$0xff] }
  0x10   :  { %v222_v61 = vmul.f32 %v640_v21, %v187_v50  ;;  %550 = vmatprep.mubr.msk.f32.mxu0 %vm247_vm1, %v230_v60  ;;  %v157_v22 = vadd.f32 %v492_v63, %v141_v11  ;;  %v102_v23 = vmax.f32 %v485_v18, %v501_v7  ;;  %v134_v24 = vadd.f32 %v469_v6, %v19_v5  ;;  %v493_v25 = vld [vmem:[%s915_s2 + $0x158] sm:$0xff]  ;;  %v510_v49 = vld [vmem:[%s915_s2 + $0x1e0] sm:$0xff]  ;;  %v21_v63 = vld [vmem:[%s915_s2 + $0x28] sm:$0xff] }
  0x11   :  { %v94_v26 = vmax.f32 %v27_v19, %v477_v20  ;;  %551 = vmatmul.mubr.msk.f32.vlgmr.msra.gmra.mrb[0].mxu0 %vm247_vm1, %v231_v14  ;;  %v223_v27 = vmul.f32 %v640_v21, %v188_v15  ;;  %v181_v28 = vmul.f32 0.25, %v165_v16  ;;  %v206_v29 = vmul.f32 %v620_v9, %v125_v17  ;;  %v494_v57 = vld [vmem:[%s915_s2 + $0x160] sm:$0xff]  ;;  %v503_v1 = vld [vmem:[%s915_s2 + $0x1a8] sm:$0xff] }
  0x12   :  { %v238_v8 = vadd.f32 %v222_v61, %v204_v40  ;;  %v110_v30 = vmax.f32 %v493_v25, %v509_v13  ;;  %v173_v31 = vadd.f32 %v508_v53, %v157_v22  ;;  %v118_v32 = vmax.f32 %v86_v12, %v102_v23  ;;  %v487_v11 = vld [vmem:[%s915_s2 + $0x128] sm:$0xff] }
  0x13   :  { %v150_v33 = vadd.f32 %v485_v18, %v134_v24  ;;  %v142_v34 = vadd.f32 %v477_v20, %v27_v19  ;;  %v239_v38 = vadd.f32 %v223_v27, %v205_v56  ;;  %v216_v39 = vmul.f32 %v640_v21, %v181_v28  ;;  %v511_v12 = vld [vmem:[%s915_s2 + $0x1e8] sm:$0xff] }
  0x14   :  { %562 = vmatprep.mubr.msk.f32.mxu1 %vm247_vm1, %v238_v8  ;;  %v126_v40 = vmax.f32 %v94_v26, %v110_v30  ;;  %v87_v42 = vmax.f32 %v20_v35, %v470_v36  ;;  %v189_v43 = vmul.f32 0.25, %v173_v31  ;;  %v199_v45 = vmul.f32 %v620_v9, %v118_v32  ;;  %v29_v17 = vld [vmem:[%s915_s2 + $0x68] sm:$0xff]  ;;  %v22_v30 = vld [vmem:[%s915_s2 + $0x30] sm:$0xff] }
  0x15   :  { %v166_v44 = vadd.f32 %v501_v7, %v150_v33  ;;  %v158_v46 = vadd.f32 %v493_v25, %v142_v34  ;;  %563 = vmatmul.mubr.msk.f32.vlgmr.msra.gmra.mrb[0].mxu1 %vm247_vm1, %v239_v38  ;;  %v232_v50 = vadd.f32 %v216_v39, %v198_v10  ;;  %v103_v52 = vmax.f32 %v486_v41, %v502_v37  ;;  %v479_v18 = vld [vmem:[%s915_s2 + $0xe8] sm:$0xff]  ;;  %v504_v25 = vld [vmem:[%s915_s2 + $0x1b0] sm:$0xff] }
  0x16   :  { %v207_v51 = vmul.f32 %v620_v9, %v126_v40  ;;  %v135_v53 = vadd.f32 %v470_v36, %v20_v35  ;;  %v224_v54 = vmul.f32 %v640_v21, %v189_v43  ;;  %v95_v58 = vmax.f32 %v28_v47, %v478_v48  ;;  %v495_v23 = vld [vmem:[%s915_s2 + $0x168] sm:$0xff]  ;;  %v472_v31 = vld [vmem:[%s915_s2 + $0xb0] sm:$0xff] }
  0x17   :  { %v182_v55 = vmul.f32 0.25, %v166_v44  ;;  %v174_v56 = vadd.f32 %v509_v13, %v158_v46  ;;  %553 = vmatprep.mubr.msk.f32.mxu0 %vm247_vm1, %v232_v50  ;;  %v119_v59 = vmax.f32 %v87_v42, %v103_v52  ;;  %v111_v61 = vmax.f32 %v494_v57, %v510_v49  ;;  %v488_v35 = vld [vmem:[%s915_s2 + $0x130] sm:$0xff]  ;;  %v505_v52 = vld [vmem:[%s915_s2 + $0x1b8] sm:$0xff] }
  0x18   :  { %v151_v60 = vadd.f32 %v486_v41, %v135_v53  ;;  %v143_v62 = vadd.f32 %v478_v48, %v28_v47  ;;  %v240_v2 = vadd.f32 %v224_v54, %v206_v29  ;;  %v88_v5 = vmax.f32 %v21_v63, %v471_v0  ;;  %v512_v40 = vld [vmem:[%s915_s2 + $0x1f0] sm:$0xff] }
  0x19   :  { %v217_v3 = vmul.f32 %v640_v21, %v182_v55  ;;  %v190_v4 = vmul.f32 0.25, %v174_v56  ;;  %v200_v7 = vmul.f32 %v620_v9, %v119_v59  ;;  %v127_v8 = vmax.f32 %v95_v58, %v111_v61  ;;  %v480_v46 = vld [vmem:[%s915_s2 + $0xf0] sm:$0xff]  ;;  %v473_v58 = vld [vmem:[%s915_s2 + $0xb8] sm:$0xff] }
  0x1a   :  { %v167_v6 = vadd.f32 %v502_v37, %v151_v60  ;;  %v159_v10 = vadd.f32 %v494_v57, %v143_v62  ;;  %565 = vmatprep.mubr.msk.f32.mxu1 %vm247_vm1, %v240_v2  ;;  %v104_v15 = vmax.f32 %v487_v11, %v503_v1  ;;  %v136_v16 = vadd.f32 %v471_v0, %v21_v63  ;;  %v496_v50 = vld [vmem:[%s915_s2 + $0x170] sm:$0xff]  ;;  %v23_v57 = vld [vmem:[%s915_s2 + $0x38] sm:$0xff] }
  0x1b   :  { %v233_v13 = vadd.f32 %v217_v3, %v199_v45  ;;  %v225_v14 = vmul.f32 %v640_v21, %v190_v4  ;;  %v208_v22 = vmul.f32 %v620_v9, %v127_v8  ;;  %v96_v24 = vmax.f32 %v29_v17, %v479_v18  ;;  %v30_v45 = vld [vmem:[%s915_s2 + $0x70] sm:$0xff]  ;;  %v489_v62 = vld [vmem:[%s915_s2 + $0x138] sm:$0xff] }
  0x1c   :  { %v183_v19 = vmul.f32 0.25, %v167_v6  ;;  %v175_v20 = vadd.f32 %v510_v49, %v159_v10  ;;  %v120_v27 = vmax.f32 %v88_v5, %v104_v15  ;;  %v152_v28 = vadd.f32 %v487_v11, %v136_v16  ;;  %v31_v4 = vld [vmem:[%s915_s2 + $0x78] sm:$0xff] }
  0x1d   :  { %554 = vmatmul.mubr.msk.f32.gmra.mrb[2].mxu0 %vm247_vm1, %v233_v13  ;;  %v241_v26 = vadd.f32 %v225_v14, %v207_v51  ;;  %v112_v29 = vmax.f32 %v495_v23, %v511_v12  ;;  %v144_v34 = vadd.f32 %v479_v18, %v29_v17  ;;  %v89_v36 = vmax.f32 %v22_v30, %v472_v31  ;;  %v481_v5 = vld [vmem:[%s915_s2 + $0xf8] sm:$0xff] }
  0x1e   :  { %v218_v32 = vmul.f32 %v640_v21, %v183_v19  ;;  %v191_v33 = vmul.f32 0.25, %v175_v20  ;;  %v168_v37 = vadd.f32 %v503_v1, %v152_v28  ;;  %v105_v39 = vmax.f32 %v488_v35, %v504_v25  ;;  %v513_v6 = vld [vmem:[%s915_s2 + $0x1f8] sm:$0xff] }
  0x1f   :  { %566 = vmatmul.mubr.msk.f32.gmra.mrb[2].mxu1 %vm247_vm1, %v241_v26  ;;  %v128_v38 = vmax.f32 %v96_v24, %v112_v29  ;;  %v160_v43 = vadd.f32 %v495_v23, %v144_v34  ;;  %v137_v44 = vadd.f32 %v472_v31, %v22_v30  ;;  %v201_v48 = vmul.f32 %v620_v9, %v120_v27  ;;  %v497_v16 = vld [vmem:[%s915_s2 + $0x178] sm:$0xff] }
  0x20   :  { %v234_v41 = vadd.f32 %v218_v32, %v200_v7  ;;  %v226_v42 = vmul.f32 %v640_v21, %v191_v33  ;;  %v184_v47 = vmul.f32 0.25, %v168_v37  ;;  %v121_v49 = vmax.f32 %v89_v36, %v105_v39 }
  0x21   :  { %v97_v51 = vmax.f32 %v30_v45, %v480_v46  ;;  %v176_v54 = vadd.f32 %v511_v12, %v160_v43  ;;  %v153_v55 = vadd.f32 %v488_v35, %v137_v44  ;;  %v113_v56 = vmax.f32 %v496_v50, %v512_v40 }
  0x22   :  { %556 = vmatprep.mubr.msk.f32.mxu0 %vm247_vm1, %v234_v41  ;;  %v242_v53 = vadd.f32 %v226_v42, %v208_v22  ;;  %v219_v59 = vmul.f32 %v640_v21, %v184_v47  ;;  %v209_v60 = vmul.f32 %v620_v9, %v128_v38  ;;  %v145_v61 = vadd.f32 %v480_v46, %v30_v45 }
  0x23   :  { %v90_v63 = vmax.f32 %v23_v57, %v473_v58  ;;  %v192_v0 = vmul.f32 0.25, %v176_v54  ;;  %v169_v1 = vadd.f32 %v504_v25, %v153_v55  ;;  %v129_v2 = vmax.f32 %v97_v51, %v113_v56 }
  0x24   :  { %568 = vmatprep.mubr.msk.f32.mxu1 %vm247_vm1, %v242_v53  ;;  %v106_v3 = vmax.f32 %v489_v62, %v505_v52  ;;  %v235_v7 = vadd.f32 %v219_v59, %v201_v48  ;;  %v161_v8 = vadd.f32 %v496_v50, %v145_v61  ;;  %v138_v10 = vadd.f32 %v473_v58, %v23_v57 }
  0x25   :  { %v98_v11 = vmax.f32 %v31_v4, %v481_v5  ;;  %v227_v12 = vmul.f32 %v640_v21, %v192_v0  ;;  %v185_v13 = vmul.f32 0.25, %v169_v1  ;;  %v202_v14 = vmul.f32 %v620_v9, %v121_v49 }
  0x26   :  { %v122_v15 = vmax.f32 %v90_v63, %v106_v3  ;;  %557 = vmatmul.mubr.msk.f32.gmra.mrb[4].mxu0 %vm247_vm1, %v235_v7  ;;  %v177_v17 = vadd.f32 %v512_v40, %v161_v8  ;;  %v154_v18 = vadd.f32 %v489_v62, %v138_v10  ;;  %v114_v19 = vmax.f32 %v497_v16, %v513_v6 }
  0x27   :  { %v146_v20 = vadd.f32 %v481_v5, %v31_v4  ;;  %v243_v22 = vadd.f32 %v227_v12, %v209_v60  ;;  %v220_v23 = vmul.f32 %v640_v21, %v185_v13  ;;  %v210_v24 = vmul.f32 %v620_v9, %v129_v2 }
  0x28   :  { %v193_v25 = vmul.f32 0.25, %v177_v17  ;;  %v170_v26 = vadd.f32 %v505_v52, %v154_v18  ;;  %v130_v27 = vmax.f32 %v98_v11, %v114_v19  ;;  %v203_v32 = vmul.f32 %v620_v9, %v122_v15 }
  0x29   :  { %v162_v28 = vadd.f32 %v497_v16, %v146_v20  ;;  %569 = vmatmul.mubr.msk.f32.gmra.mrb[4].mxu1 %vm247_vm1, %v243_v22  ;;  %v236_v29 = vadd.f32 %v220_v23, %v202_v14 }
  0x2a   :  { %v228_v30 = vmul.f32 %v640_v21, %v193_v25  ;;  %v186_v31 = vmul.f32 0.25, %v170_v26  ;;  %v211_v37 = vmul.f32 %v620_v9, %v130_v27 }
  0x2b   :  { %v178_v33 = vadd.f32 %v513_v6, %v162_v28  ;;  %559 = vmatprep.mubr.msk.f32.mxu0 %vm247_vm1, %v236_v29 }
  0x2c   :  { %v244_v34 = vadd.f32 %v228_v30, %v210_v24  ;;  %v221_v35 = vmul.f32 %v640_v21, %v186_v31 }
  0x2d   :  { %v194_v36 = vmul.f32 0.25, %v178_v33 }
  0x2e   :  { %571 = vmatprep.mubr.msk.f32.mxu1 %vm247_vm1, %v244_v34  ;;  %v237_v38 = vadd.f32 %v221_v35, %v203_v32 }
  0x2f   :  { %v229_v39 = vmul.f32 %v640_v21, %v194_v36 }
  0x30   :  { %560 = vmatmul.mubr.msk.f32.gmra.mrb[6].mxu0 %vm247_vm1, %v237_v38 }
  0x31   :  { %v245_v40 = vadd.f32 %v229_v39, %v211_v37 }
  0x33   :  { %572 = vmatmul.mubr.msk.f32.gmra.mrb[6].mxu1 %vm247_vm1, %v245_v40 }
  0xe4   :  { %v552_v41 = vpop.f32.mrb[0].mxu0 }
  0xe5   :  { %447 = vst.msk [vmem:[%s916_s3 + $0x8] sm:$0xff] %vm445_vm2, %v552_v41  ;;  %v366_v42 = vpop.f32.mrb[1].mxu0 }
  0xe6   :  { %446 = vst.msk [vmem:[%s916_s3] sm:$0xff] %vm445_vm2, %v366_v42 }
  0xe8   :  { %v564_v9 = vpop.f32.mrb[0].mxu1 }
  0xe9   :  { %455 = vst.msk [vmem:[%s916_s3 + $0x48] sm:$0xff] %vm445_vm2, %v564_v9  ;;  %v406_v21 = vpop.f32.mrb[1].mxu1 }
  0xea   :  { %454 = vst.msk [vmem:[%s916_s3 + $0x40] sm:$0xff] %vm445_vm2, %v406_v21 }
  0xf0   :  { %v555_v43 = vpop.f32.mrb[2].mxu0 }
  0xf1   :  { %449 = vst.msk [vmem:[%s916_s3 + $0x18] sm:$0xff] %vm445_vm2, %v555_v43  ;;  %v376_v44 = vpop.f32.mrb[3].mxu0 }
  0xf2   :  { %v567_v45 = vpop.f32.mrb[2].mxu1  ;;  %448 = vst.msk [vmem:[%s916_s3 + $0x10] sm:$0xff] %vm445_vm2, %v376_v44 }
  0xf3   :  { %457 = vst.msk [vmem:[%s916_s3 + $0x58] sm:$0xff] %vm445_vm2, %v567_v45  ;;  %v416_v46 = vpop.f32.mrb[3].mxu1 }
  0xf4   :  { %456 = vst.msk [vmem:[%s916_s3 + $0x50] sm:$0xff] %vm445_vm2, %v416_v46 }
  0xf9   :  { %v558_v47 = vpop.f32.mrb[4].mxu0 }
  0xfa   :  { %451 = vst.msk [vmem:[%s916_s3 + $0x28] sm:$0xff] %vm445_vm2, %v558_v47  ;;  %v386_v48 = vpop.f32.mrb[5].mxu0 }
  0xfb   :  { %450 = vst.msk [vmem:[%s916_s3 + $0x20] sm:$0xff] %vm445_vm2, %v386_v48 }
  0xfc   :  { %v570_v49 = vpop.f32.mrb[4].mxu1 }
  0xfd   :  { %459 = vst.msk [vmem:[%s916_s3 + $0x68] sm:$0xff] %vm445_vm2, %v570_v49  ;;  %v426_v50 = vpop.f32.mrb[5].mxu1 }
  0xfe   :  { %458 = vst.msk [vmem:[%s916_s3 + $0x60] sm:$0xff] %vm445_vm2, %v426_v50 }
 0x103   :  { %v561_v51 = vpop.f32.mrb[6].mxu0 }
 0x104   :  { %453 = vst.msk [vmem:[%s916_s3 + $0x38] sm:$0xff] %vm445_vm2, %v561_v51  ;;  %v396_v52 = vpop.f32.mrb[7].mxu0 }
 0x105   :  { %452 = vst.msk [vmem:[%s916_s3 + $0x30] sm:$0xff] %vm445_vm2, %v396_v52 }
 0x106   :  { %v573_v53 = vpop.f32.mrb[6].mxu1 }
 0x107   :  { %461 = vst.msk [vmem:[%s916_s3 + $0x78] sm:$0xff] %vm445_vm2, %v573_v53  ;;  %v436_v54 = vpop.f32.mrb[7].mxu1 }
 0x108   :  { %460 = vst.msk [vmem:[%s916_s3 + $0x70] sm:$0xff] %vm445_vm2, %v436_v54 }

</bundles_post_ra>
